<compile_context>
chip_gen: v7x
topology: tpu7x:2x2x1
jax: 0.10.0
libtpu: 0.0.40
codegen_flags: <defaults>
</compile_context>

<pallas_src>
import functools

import jax
import jax.numpy as jnp
from jax.experimental import pallas as pl
from jax.experimental.pallas import tpu as pltpu


def _round_up(x, m):
    return ((x + m - 1) // m) * m


def _agg_edge_kernel(dst_ref, h_ref, e_ref, inv_ref, oh_ref, oe_ref, acc_ref,
                     *, tile_n):
    """Grid = (node tiles [parallel], edge tiles [arbitrary / reduction])."""
    i = pl.program_id(0)          # node-tile index
    k = pl.program_id(1)          # edge-tile (reduction) index

    @pl.when(k == 0)
    def _init():
        acc_ref[...] = jnp.zeros_like(acc_ref)

    # Rebuild the one-hot dst-incidence tile in-register from the index vector:
    #   onehot[r, e] = 1  iff  dst(e) == global_row(r)
    tile_e = dst_ref.shape[1]
    row_ids = i * tile_n + jax.lax.broadcasted_iota(jnp.int32, (tile_n, tile_e), 0)
    hit = row_ids == dst_ref[...]                       # (tile_n, tile_e) bool
    onehot = jnp.where(hit,
                       jnp.ones((), e_ref.dtype),
                       jnp.zeros((), e_ref.dtype))      # exact in bf16

    # MXU: sum incoming edge labels for each node row; accumulate in f32.
    acc_ref[...] += jnp.dot(onehot, e_ref[...],
                            preferred_element_type=jnp.float32)

    @pl.when(k == pl.num_programs(1) - 1)
    def _finalize():
        def elu(x):
            # alpha = 1.0; guard exp against the unused positive branch
            return jnp.where(x > 0, x, jnp.exp(jnp.minimum(x, 0.0)) - 1.0)

        oh_ref[...] = elu(h_ref[...].astype(jnp.float32)).astype(oh_ref.dtype)
        scaled = acc_ref[...] * inv_ref[...]            # / degree-bucket size
        oe_ref[...] = elu(scaled).astype(oe_ref.dtype)


def weighted_agg_edge(h, e_lbl, dst, *, tile_n=256, tile_e=512,
                      mxu_dtype=jnp.bfloat16):
    """Pallas implementation of WeightedAggEdge.forward.

    h     : [N, D_n] float32 node features
    e_lbl : [E, D_e] float32 edge label features
    dst   : [E]      int32   destination node of each edge
    returns [N, D_n + D_e] float32 == elu(concat([h, agg(e_lbl)/bucket], 1))
    """
    N, D_n = h.shape
    E, D_e = e_lbl.shape

    # ---- glue (plain JAX): DGL degree-bucket divisor -----------------------
    indeg = jnp.bincount(dst, length=N)                 # in-degree per node
    deg_count = jnp.bincount(indeg, length=E + 1)       # #nodes per degree
    divisor = deg_count[indeg].astype(jnp.float32)      # len(nodes) per bucket
    inv_div = (1.0 / jnp.maximum(divisor, 1.0)).reshape(N, 1)

    # ---- tiling / padding (ragged N and E handled by padding) --------------
    tn = min(tile_n, _round_up(N, 8))                   # don't over-pad tiny N
    te = min(tile_e, _round_up(E, 128))                 # lane-aligned edge tile
    N_pad = _round_up(N, tn)
    E_pad = _round_up(E, te)

    h_p = jnp.zeros((N_pad, D_n), jnp.float32).at[:N].set(h.astype(jnp.float32))
    inv_p = jnp.ones((N_pad, 1), jnp.float32).at[:N].set(inv_div)
    e_p = jnp.zeros((E_pad, D_e), mxu_dtype).at[:E].set(e_lbl.astype(mxu_dtype))
    # padded edges get dst = -1 -> never equal any node row -> contribute 0
    dst_p = jnp.full((1, E_pad), -1, jnp.int32).at[0, :E].set(dst.astype(jnp.int32))

    grid = (N_pad // tn, E_pad // te)
    kernel = functools.partial(_agg_edge_kernel, tile_n=tn)

    out_h, out_e = pl.pallas_call(
        kernel,
        out_shape=(jax.ShapeDtypeStruct((N_pad, D_n), jnp.float32),
                   jax.ShapeDtypeStruct((N_pad, D_e), jnp.float32)),
        grid_spec=pltpu.PrefetchScalarGridSpec(
            num_scalar_prefetch=0,
            grid=grid,
            in_specs=[
                pl.BlockSpec((1, te), lambda i, k: (0, k)),      # dst indices
                pl.BlockSpec((tn, D_n), lambda i, k: (i, 0)),    # node features
                pl.BlockSpec((te, D_e), lambda i, k: (k, 0)),    # edge labels
                pl.BlockSpec((tn, 1), lambda i, k: (i, 0)),      # 1/bucket size
            ],
            out_specs=(pl.BlockSpec((tn, D_n), lambda i, k: (i, 0)),
                       pl.BlockSpec((tn, D_e), lambda i, k: (i, 0))),
            scratch_shapes=[pltpu.VMEM((tn, D_e), jnp.float32)],  # accumulator
        ),
        compiler_params=pltpu.CompilerParams(
            dimension_semantics=("parallel", "arbitrary")),
    )(dst_p, h_p, e_p, inv_p)

    return jnp.concatenate([out_h[:N], out_e[:N]], axis=1)


def weighted_agg_edge_ref(h, e_lbl, dst):
    """Pure-JAX reference (mirrors the DGL update_all semantics, full f32)."""
    N = h.shape[0]
    E = e_lbl.shape[0]
    adj = (dst[None, :] == jnp.arange(N)[:, None]).astype(jnp.float32)
    accum = adj @ e_lbl
    indeg = jnp.bincount(dst, length=N)
    deg_count = jnp.bincount(indeg, length=E + 1)
    divisor = jnp.maximum(deg_count[indeg].astype(jnp.float32), 1.0)[:, None]
    z = jnp.concatenate([h, accum / divisor], axis=1)
    return jnp.where(z > 0, z, jnp.exp(jnp.minimum(z, 0.0)) - 1.0)


if __name__ == "__main__":
    # Small shapes consistent with the module.
    N = 16                # nodes
    E = 32                # edges
    node_dim = 16
    edge_lbl_dim = 8
    edge_ft_out_dim = 8   # used only by the fc layer, which forward() ignores
    z_concat_edges_dim = node_dim + edge_lbl_dim

    key = jax.random.PRNGKey(0)
    k_h, k_e, k_w = jax.random.split(key, 3)

    h = jax.random.normal(k_h, (N, node_dim), dtype=jnp.float32)
    e_lbl = jax.random.normal(k_e, (E, edge_lbl_dim), dtype=jnp.float32)

    # Deterministic graph: each node gets 2 incoming edges (dst covers all nodes).
    dst = jnp.concatenate([jnp.arange(N, dtype=jnp.int32),
                           jnp.arange(N, dtype=jnp.int32)])

    # nn.Linear(edge_lbl_dim, edge_ft_out_dim, bias=False) from __init__:
    # initialized but never used in forward() of the original module.
    fc_weight = jax.random.normal(k_w, (edge_ft_out_dim, edge_lbl_dim),
                                  dtype=jnp.float32) * 0.1  # unused in forward

    ref = weighted_agg_edge_ref(h, e_lbl, dst)

    # f32 MXU path: tight check against the f32 reference.
    out_f32 = jax.block_until_ready(
        weighted_agg_edge(h, e_lbl, dst, mxu_dtype=jnp.float32))
    assert out_f32.shape == (N, z_concat_edges_dim)
    assert jnp.allclose(out_f32, ref, atol=1e-4, rtol=1e-4), "f32 mismatch vs reference"

    # Default bf16 MXU path (perf config): one-hot is exact, e_lbl rounds to bf16.
    out_bf16 = jax.block_until_ready(weighted_agg_edge(h, e_lbl, dst))
    assert out_bf16.shape == (N, z_concat_edges_dim)
    assert jnp.allclose(out_bf16, ref, atol=5e-2, rtol=5e-2), "bf16 mismatch vs reference"

    print("KERNEL_OK")
</pallas_src>

<mosaic_0001>
module attributes {stable_mosaic.version = 11 : i64} {
  func.func @_agg_edge_kernel(%arg0: i32, %arg1: i32, %arg2: memref<1x128xi32, #tpu.memory_space<vmem>>, %arg3: memref<16x16xf32, #tpu.memory_space<vmem>>, %arg4: memref<128x8xf32, #tpu.memory_space<vmem>>, %arg5: memref<16x1xf32, #tpu.memory_space<vmem>>, %arg6: memref<16x16xf32, #tpu.memory_space<vmem>>, %arg7: memref<16x8xf32, #tpu.memory_space<vmem>>, %arg8: memref<16x8xf32, #tpu.memory_space<vmem>>) attributes {dimension_semantics = [#tpu.dimension_semantics<parallel>, #tpu.dimension_semantics<arbitrary>], iteration_bounds = array<i64: 1, 1>, scalar_prefetch = 0 : i64, scratch_operands = 1 : i64, tpu.core_type = #tpu.core_type<tc>, window_params = [{transform_indices = @transform_0, window_bounds = array<i64: 1, 128>}, {transform_indices = @transform_1, window_bounds = array<i64: 16, 16>}, {transform_indices = @transform_2, window_bounds = array<i64: 128, 8>}, {transform_indices = @transform_3, window_bounds = array<i64: 16, 1>}, {transform_indices = @transform_4, window_bounds = array<i64: 16, 16>}, {transform_indices = @transform_5, window_bounds = array<i64: 16, 8>}]} {
    %c0_i32 = arith.constant 0 : i32
    %0 = arith.cmpi eq, %arg1, %c0_i32 : i32
    %1 = arith.extui %0 : i1 to i32
    %c0_i32_0 = arith.constant 0 : i32
    %2 = arith.cmpi ne, %1, %c0_i32_0 : i32
    scf.if %2 {
      %cst_12 = arith.constant 0.000000e+00 : f32
      %21 = vector.broadcast %cst_12 : f32 to vector<16x8xf32>
      %c0_13 = arith.constant 0 : index
      %c0_14 = arith.constant 0 : index
      %22 = vector.load %arg8[%c0_13, %c0_14] : memref<16x8xf32, #tpu.memory_space<vmem>>, vector<16x8xf32>
      tpu.vector_store %arg8[%c0_13, %c0_14], %21 {strides = array<i32>} : memref<16x8xf32, #tpu.memory_space<vmem>>, vector<16x8xf32>,
    } else {
    }
    %c16_i32 = arith.constant 16 : i32
    %3 = arith.muli %arg0, %c16_i32 : i32
    %4 = tpu.iota {dimensions = array<i32: 0>} : vector<16x128xi32>
    %5 = vector.broadcast %3 : i32 to vector<16x128xi32>
    %6 = arith.addi %5, %4 : vector<16x128xi32>
    %c0 = arith.constant 0 : index
    %c0_1 = arith.constant 0 : index
    %7 = vector.load %arg2[%c0, %c0_1] : memref<1x128xi32, #tpu.memory_space<vmem>>, vector<1x128xi32>
    %8 = vector.broadcast %7 : vector<1x128xi32> to vector<16x128xi32>
    %9 = arith.cmpi eq, %6, %8 : vector<16x128xi32>
    %cst = arith.constant 1.000000e+00 : f32
    %cst_2 = arith.constant 0.000000e+00 : f32
    %10 = vector.broadcast %cst : f32 to vector<16x128xf32>
    %11 = vector.broadcast %cst_2 : f32 to vector<16x128xf32>
    %12 = arith.select %9, %10, %11 : vector<16x128xi1>, vector<16x128xf32>
    %c0_3 = arith.constant 0 : index
    %c0_4 = arith.constant 0 : index
    %13 = vector.load %arg8[%c0_3, %c0_4] : memref<16x8xf32, #tpu.memory_space<vmem>>, vector<16x8xf32>
    %c0_5 = arith.constant 0 : index
    %c0_6 = arith.constant 0 : index
    %14 = vector.load %arg4[%c0_5, %c0_6] : memref<128x8xf32, #tpu.memory_space<vmem>>, vector<128x8xf32>
    %cst_7 = arith.constant dense<0.000000e+00> : vector<16x8xf32>
    %15 = tpu.matmul %12, %14, %cst_7 {dimension_numbers = #tpu.dot_dimension_numbers<[1], [0], [0], [1], [0, 0, 1, 1], [], []>} : vector<16x128xf32>, vector<128x8xf32>, vector<16x8xf32> -> vector<16x8xf32>
    %16 = arith.addf %13, %15 : vector<16x8xf32>
    %c0_8 = arith.constant 0 : index
    %c0_9 = arith.constant 0 : index
    %17 = vector.load %arg8[%c0_8, %c0_9] : memref<16x8xf32, #tpu.memory_space<vmem>>, vector<16x8xf32>
    tpu.vector_store %arg8[%c0_8, %c0_9], %16 {strides = array<i32>} : memref<16x8xf32, #tpu.memory_space<vmem>>, vector<16x8xf32>,
    %c0_i32_10 = arith.constant 0 : i32
    %18 = arith.cmpi eq, %arg1, %c0_i32_10 : i32
    %19 = arith.extui %18 : i1 to i32
    %c0_i32_11 = arith.constant 0 : i32
    %20 = arith.cmpi ne, %19, %c0_i32_11 : i32
    scf.if %20 {
      %c0_12 = arith.constant 0 : index
      %c0_13 = arith.constant 0 : index
      %21 = vector.load %arg3[%c0_12, %c0_13] : memref<16x16xf32, #tpu.memory_space<vmem>>, vector<16x16xf32>
      %cst_14 = arith.constant 0.000000e+00 : f32
      %22 = vector.broadcast %cst_14 : f32 to vector<16x16xf32>
      %23 = arith.cmpf ogt, %21, %22 : vector<16x16xf32>
      %cst_15 = arith.constant 0.000000e+00 : f32
      %24 = vector.broadcast %cst_15 : f32 to vector<16x16xf32>
      %25 = arith.minimumf %21, %24 : vector<16x16xf32>
      %26 = math.exp %25 : vector<16x16xf32>
      %cst_16 = arith.constant 1.000000e+00 : f32
      %27 = vector.broadcast %cst_16 : f32 to vector<16x16xf32>
      %28 = arith.subf %26, %27 : vector<16x16xf32>
      %29 = arith.select %23, %21, %28 : vector<16x16xi1>, vector<16x16xf32>
      %c0_17 = arith.constant 0 : index
      %c0_18 = arith.constant 0 : index
      %30 = vector.load %arg6[%c0_17, %c0_18] : memref<16x16xf32, #tpu.memory_space<vmem>>, vector<16x16xf32>
      tpu.vector_store %arg6[%c0_17, %c0_18], %29 {strides = array<i32>} : memref<16x16xf32, #tpu.memory_space<vmem>>, vector<16x16xf32>,
      %c0_19 = arith.constant 0 : index
      %c0_20 = arith.constant 0 : index
      %31 = vector.load %arg8[%c0_19, %c0_20] : memref<16x8xf32, #tpu.memory_space<vmem>>, vector<16x8xf32>
      %c0_21 = arith.constant 0 : index
      %c0_22 = arith.constant 0 : index
      %32 = vector.load %arg5[%c0_21, %c0_22] : memref<16x1xf32, #tpu.memory_space<vmem>>, vector<16x1xf32>
      %33 = vector.broadcast %32 : vector<16x1xf32> to vector<16x8xf32>
      %34 = arith.mulf %31, %33 : vector<16x8xf32>
      %cst_23 = arith.constant 0.000000e+00 : f32
      %35 = vector.broadcast %cst_23 : f32 to vector<16x8xf32>
      %36 = arith.cmpf ogt, %34, %35 : vector<16x8xf32>
      %cst_24 = arith.constant 0.000000e+00 : f32
      %37 = vector.broadcast %cst_24 : f32 to vector<16x8xf32>
      %38 = arith.minimumf %34, %37 : vector<16x8xf32>
      %39 = math.exp %38 : vector<16x8xf32>
      %cst_25 = arith.constant 1.000000e+00 : f32
      %40 = vector.broadcast %cst_25 : f32 to vector<16x8xf32>
      %41 = arith.subf %39, %40 : vector<16x8xf32>
      %42 = arith.select %36, %34, %41 : vector<16x8xi1>, vector<16x8xf32>
      %c0_26 = arith.constant 0 : index
      %c0_27 = arith.constant 0 : index
      %43 = vector.load %arg7[%c0_26, %c0_27] : memref<16x8xf32, #tpu.memory_space<vmem>>, vector<16x8xf32>
      tpu.vector_store %arg7[%c0_26, %c0_27], %42 {strides = array<i32>} : memref<16x8xf32, #tpu.memory_space<vmem>>, vector<16x8xf32>,
    } else {
    }
    return
  }
  func.func @transform_0(%arg0: i32, %arg1: i32) -> (i32, i32) {
    %c0_i32 = arith.constant 0 : i32
    %c0_i32_0 = arith.constant 0 : i32
    return %c0_i32, %arg1 : i32, i32
  }
  func.func @transform_1(%arg0: i32, %arg1: i32) -> (i32, i32) {
    %c0_i32 = arith.constant 0 : i32
    %c0_i32_0 = arith.constant 0 : i32
    return %arg0, %c0_i32 : i32, i32
  }
  func.func @transform_2(%arg0: i32, %arg1: i32) -> (i32, i32) {
    %c0_i32 = arith.constant 0 : i32
    %c0_i32_0 = arith.constant 0 : i32
    return %arg1, %c0_i32 : i32, i32
  }
  func.func @transform_3(%arg0: i32, %arg1: i32) -> (i32, i32) {
    %c0_i32 = arith.constant 0 : i32
    %c0_i32_0 = arith.constant 0 : i32
    return %arg0, %c0_i32 : i32, i32
  }
  func.func @transform_4(%arg0: i32, %arg1: i32) -> (i32, i32) {
    %c0_i32 = arith.constant 0 : i32
    %c0_i32_0 = arith.constant 0 : i32
    return %arg0, %c0_i32 : i32, i32
  }
  func.func @transform_5(%arg0: i32, %arg1: i32) -> (i32, i32) {
    %c0_i32 = arith.constant 0 : i32
    %c0_i32_0 = arith.constant 0 : i32
    return %arg0, %c0_i32 : i32, i32
  }
}

</mosaic_0001>

<bundles_post_ra>
// kernel: tpu_custom_call.1
= control target key start
LH: loop header
LB: loop body
LE: loop exit
PB: predicated region body
PF: predicated region fallthrough
CT: control target
= control target key end

     0   :  { %v28_v3 = vlaneseq  ;;  %vm24_vm0 = vcmask 64512   ;;  %v342_v6 = vmov 0   ;;  %v343_v11 = vmov 0.0   ;;  %s465_s0 = inlined_call_operand.vmem [shape: s32[1,128], index: 0, kind: input, shape index: {}]   ;;  %s466_s1 = inlined_call_operand.vmem [shape: f32[16,16], index: 1, kind: input, shape index: {}]   ;;  %s467_s2 = inlined_call_operand.vmem [shape: f32[128,8], index: 2, kind: input, shape index: {}]   ;;  %s468_s3 = inlined_call_operand.vmem [shape: f32[16,1], index: 3, kind: input, shape index: {}]   ;;  %s469_s4 = inlined_call_operand.hbm [shape: f32[16,16], index: 4, kind: output, shape index: {0}]   ;;  %s470_s5 = inlined_call_operand.vmem [shape: f32[16,8], index: 5, kind: output, shape index: {1}]  }
   0x1   :  { %v45_v0 = vld [vmem:[%s467_s2] sm:$0xff]  ;;  %v46_v1 = vld [vmem:[%s467_s2 + $0x8] sm:$0xff]  ;;  %v47_v2 = vld [vmem:[%s467_s2 + $0x10] sm:$0xff]  ;;  %309 = vset.pattern.permute.xlu0 %v342_v6  ;;  %26 = vst.msk [vmem:[#allocation2 + $0x8] sm:$0xff] %vm24_vm0, %v343_v11 }
   0x2   :  { %v271_v4 = vpack.c.bf16 %v46_v1, %v45_v0  ;;  %v48_v5 = vld [vmem:[%s467_s2 + $0x18] sm:$0xff]  ;;  %v49_v8 = vld [vmem:[%s467_s2 + $0x20] sm:$0xff]  ;;  %v50_v9 = vld [vmem:[%s467_s2 + $0x28] sm:$0xff]  ;;  %v29_v10 = vshrl.u32 %v28_v3, 7  ;;  %25 = vst.msk [vmem:[#allocation2] sm:$0xff] %vm24_vm0, %v343_v11 }
   0x3   :  { %v275_v7 = vpack.c.bf16 %v48_v5, %v47_v2  ;;  %v279_v12 = vpack.c.bf16 %v50_v9, %v49_v8  ;;  %v211_v13 = vld [vmem:[%s465_s0] ss:$0 sm:$0xff]  ;;  %v51_v15 = vld [vmem:[%s467_s2 + $0x30] sm:$0xff]  ;;  %v52_v16 = vld [vmem:[%s467_s2 + $0x38] sm:$0xff] }
   0x4   :  { %272 = vmatprep.subr.bf16.mxu0 %v271_v4  ;;  %v163_v14 = vld [vmem:[%s468_s3] sm:$0xff]  ;;  %vm39_vm1 = vcmp.eq.s32.totalorder %v29_v10, %v211_v13 }
   0x5   :  { %274 = vmatpush3.bf16.msra.mxu0 %v271_v4  ;;  %167 = vperm.xlu0 %309, %v163_v14  }
   0x6   :  { %276 = vmatprep.subr.bf16.mxu0 %v275_v7 }
   0x7   :  { %11 = vsyncpa [#allocation4], 0  ;;  %v344_v17 = vmov 1.0   ;;  %v164_v18 = vld [vmem:[%s468_s3 + $0x8] sm:$0xff]  ;;  %v283_v19 = vpack.c.bf16 %v52_v16, %v51_v15  ;;  %v53_v20 = vld [vmem:[%s467_s2 + $0x40] sm:$0xff]  ;;  %v30_v32 = vadd.s32 8, %v29_v10 }
   0x8   :  { %268 = vmatprep.mubr.msk.f32.mxu0 %vm39_vm1, %v344_v17  ;;  %v54_v21 = vld [vmem:[%s467_s2 + $0x48] sm:$0xff]  ;;  %v55_v23 = vld [vmem:[%s467_s2 + $0x50] sm:$0xff]  ;;  %v56_v24 = vld [vmem:[%s467_s2 + $0x58] sm:$0xff]  ;;  %vm158_vm5 = vcmask 130048  }
   0x9   :  { %278 = vmatpush3.bf16.msra.mxu0 %v275_v7  ;;  %172 = vperm.xlu0 %309, %v164_v18   ;;  %v287_v22 = vpack.c.bf16 %v54_v21, %v53_v20  ;;  %v291_v25 = vpack.c.bf16 %v56_v24, %v55_v23  ;;  %v57_v26 = vld [vmem:[%s467_s2 + $0x60] sm:$0xff]  ;;  %v58_v27 = vld [vmem:[%s467_s2 + $0x68] sm:$0xff]  ;;  %v59_v29 = vld [vmem:[%s467_s2 + $0x70] sm:$0xff]  ;;  %vm40_vm2 = vcmp.eq.s32.totalorder %v30_v32, %v211_v13 }
   0xa   :  { %280 = vmatprep.subr.bf16.mxu0 %v279_v12  ;;  %v295_v28 = vpack.c.bf16 %v58_v27, %v57_v26  ;;  %v60_v30 = vld [vmem:[%s467_s2 + $0x78] sm:$0xff]  ;;  %v144_v33 = vld [vmem:[%s466_s1] sm:$0xff]  ;;  %v145_v34 = vld [vmem:[%s466_s1 + $0x8] sm:$0xff]  ;;  %s345_s2 = smov [#allocation3]  }
   0xb   :  { %v299_v31 = vpack.c.bf16 %v60_v30, %v59_v29  ;;  %v148_v35 = vmin.f32 %v144_v33, 0.0  ;;  %v149_v36 = vmin.f32 %v145_v34, 0.0  ;;  %vm146_vm3 = vcmp.gt.f32.partialorder %v144_v33, 0.0  ;;  %s196_s8 = sshll.u32 %s345_s2, 4  ;;  %s197_s8 = int_to_ptr.vmem [resolvable:$true] %s196_s8 }
   0xc   :  { %vm147_vm4 = vcmp.gt.f32.partialorder %v145_v34, 0.0  ;;  %s318_s1 = scalar_lea.vmem %s197_s8, 256  ;;  %p323_p1 = scmp.lt.s32.totalorder %s197_s8, %s197_s8 }
   0xd   :  { %282 = vmatpush3.bf16.msra.mxu0 %v279_v12  ;;  %v150_v37 = vmul.f32 1.442695, %v148_v35  ;;  %v152_v38 = vmul.f32 1.442695, %v149_v36  ;;  %p319_p0 = scmp.ne.s32.totalorder %s197_s8, %s318_s1  ;;  %p324_p2 = scmp.lt.s32.totalorder %s318_s1, %s318_s1 }
   0xe   :  { %284 = vmatprep.subr.bf16.mxu0 %v283_v19 }
   0xf   :  { %310 = vpow2.f32 %v150_v37  ;;  %p325_p3 = por %p324_p2, %p323_p1 }
  0x10   :  { %312 = vpow2.f32 %v152_v38 }
  0x11   :  { %286 = vmatpush3.bf16.msra.mxu0 %v283_v19  ;;  %p326_p4 = pnand %p325_p3, %p319_p0 }
  0x12   :  { %288 = vmatprep.subr.bf16.mxu0 %v287_v22 }
  0x15   :  { %290 = vmatpush3.bf16.msra.mxu0 %v287_v22 }
  0x16   :  { %292 = vmatprep.subr.bf16.mxu0 %v291_v25 }
  0x19   :  { %294 = vmatpush3.bf16.msra.mxu0 %v291_v25  ;;  %v311_v39 = vpop.eup %310 }
  0x1a   :  { %296 = vmatprep.subr.bf16.mxu0 %v295_v28  ;;  %v313_v40 = vpop.eup %312  ;;  %v214_v41 = vadd.f32 -1.0, %v311_v39 }
  0x1b   :  { %v215_v42 = vadd.f32 -1.0, %v313_v40 }
  0x1c   :  { %v156_v43 = vsel %vm146_vm3, %v144_v33, %v214_v41 }
  0x1d   :  { %298 = vmatpush3.bf16.msra.mxu0 %v295_v28  ;;  %v157_v44 = vsel %vm147_vm4, %v145_v34, %v215_v42  ;;  %159 = vst.msk [vmem:[#allocation3] sm:$0xff] %vm158_vm5, %v156_v43 }
  0x1e   :  { %300 = vmatprep.subr.bf16.mxu0 %v299_v31  ;;  %160 = vst.msk [vmem:[#allocation3 + $0x8] sm:$0xff] %vm158_vm5, %v157_v44 }
  0x21   :  { %302 = vmatpush3.bf16.msra.mxu0 %v299_v31 }
  0x24   :  { %269 = vmatmul.mubr.msk.f32.vlgmr.msra.gmra.mrb[0].mxu0 %vm40_vm2, %v344_v17 }
  0x25   :  { %329 = shalt.err (!%p326_p4)
}
  0x26   :  { %s330_s11 = scalar_lea.hbm %s469_s4, 256 }
  0x27   :  { %p331_p5 = scmp.ne.s32.totalorder %s469_s4, %s330_s11  ;;  %p334_p6 = scmp.lt.u32.totalorder %s330_s11, %s469_s4 }
  0x29   :  { %p336_p7 = pnand %p334_p6, %p331_p5 }
  0x2b   :  { %339 = shalt.err (!%p336_p7)
}
  0x2c   :  { %s346_s15 = smov 128   ;;  %s347_s16 = smov 8   ;;  %v44_v45 = vld [vmem:[#allocation2 + $0x8] sm:$0xff]  ;;  %v43_v46 = vld [vmem:[#allocation2] sm:$0xff] }
  0x2d   :  { %202 = dma.vmem_to_hbm [thread:$0]  %s197_s8, 256, %s469_s4, [#allocation4], %s346_s15, %s346_s15, %s347_s16  }
  0x84   :  { %v168_v51 = vpop.permute.xlu0 %167 }
  0x88   :  { %v173_v52 = vpop.permute.xlu0 %172 }
  0xf7   :  { %v270_v47 = vpop.f32.mrb[0].mxu0 }
  0xf8   :  { %v137_v48 = vadd.f32 %v270_v47, %v44_v45  ;;  %v127_v49 = vpop.f32.mrb[1].mxu0 }
  0xf9   :  { %v136_v50 = vadd.f32 %v127_v49, %v43_v46 }
  0xfa   :  { %140 = vst.msk [vmem:[#allocation2 + $0x8] sm:$0xff] %vm24_vm0, %v137_v48 }
  0xfb   :  { %139 = vst.msk [vmem:[#allocation2] sm:$0xff] %vm24_vm0, %v136_v50 }
 0x101   :  { %v162_v53 = vld [vmem:[#allocation2 + $0x8] sm:$0xff] }
 0x102   :  { %v161_v54 = vld [vmem:[#allocation2] sm:$0xff]  ;;  %v176_v55 = vmul.f32 %v173_v52, %v162_v53 }
 0x103   :  { %v175_v56 = vmul.f32 %v168_v51, %v161_v54 }
 0x104   :  { %v180_v57 = vmin.f32 %v176_v55, 0.0  ;;  %vm178_vm6 = vcmp.gt.f32.partialorder %v176_v55, 0.0 }
 0x105   :  { %v179_v58 = vmin.f32 %v175_v56, 0.0  ;;  %vm177_vm7 = vcmp.gt.f32.partialorder %v175_v56, 0.0 }
 0x106   :  { %v183_v59 = vmul.f32 1.442695, %v180_v57 }
 0x107   :  { %v181_v60 = vmul.f32 1.442695, %v179_v58 }
 0x108   :  { %314 = vpow2.f32 %v183_v59 }
 0x109   :  { %316 = vpow2.f32 %v181_v60 }
 0x112   :  { %v315_v61 = vpop.eup %314 }
 0x113   :  { %v317_v62 = vpop.eup %316  ;;  %v217_v63 = vadd.f32 -1.0, %v315_v61 }
 0x114   :  { %v216_v0 = vadd.f32 -1.0, %v317_v62 }
 0x115   :  { %v188_v1 = vsel %vm178_vm6, %v176_v55, %v217_v63 }
 0x116   :  { %v187_v2 = vsel %vm177_vm7, %v175_v56, %v216_v0  ;;  %190 = vst.msk [vmem:[%s470_s5 + $0x8] sm:$0xff] %vm24_vm0, %v188_v1 }
 0x117   :  { %189 = vst.msk [vmem:[%s470_s5] sm:$0xff] %vm24_vm0, %v187_v2 }
 0x118   :  { %340 = dma.done.wait [#allocation4], 256  }
 0x119   :  { %341 = vsyncadd [#allocation4], 4294967040 }
 0x11a   :  { %210 = vsyncpa [#allocation4], 1 }

</bundles_post_ra>
